<compile_context>
chip_gen: v6e
topology: v6e:2x2x1
jax: 0.10.0
libtpu: 0.0.40
codegen_flags: <defaults>
</compile_context>

<pallas_src>
import functools

import jax
import jax.numpy as jnp
import numpy as np
from jax.experimental import pallas as pl
from jax.experimental.pallas import tpu as pltpu


# ------------------------------- VMEM budgeting -------------------------------
def _vmem_budget_bytes():
    """Per-core VMEM budget: ~3/4 of physical, v7x-safe fallback."""
    cap = 64 * 1024 * 1024
    try:
        cap = int(pltpu.get_tpu_info().vmem_capacity_bytes)
    except Exception:
        pass
    if cap >= 128 * 1024 * 1024:       # v5e / v6e: 128 MiB per TensorCore
        return 96 * 1024 * 1024
    return 48 * 1024 * 1024            # v7x: 64 MiB per TensorCore (or unknown)


# --------------------- attention + noise injection kernel ---------------------
def _noise_kernel(fs_ref, ft_ref, nz_ref, o_ref, *, C, HW, temp, sigma):
    fs = fs_ref[0].astype(jnp.float32)            # (C, HW)
    ft = ft_ref[0].astype(jnp.float32)            # (C, HW)
    nz = nz_ref[0].astype(jnp.float32)            # (C, HW)

    # A_T = H*W * softmax( mean_C(|f_t|) / temp ) over the spatial positions.
    fea = jnp.mean(jnp.abs(ft), axis=0, keepdims=True)         # (1, HW)
    logits = fea * (1.0 / temp)                                 # folded divide
    e = jnp.exp(logits - jnp.max(logits))
    den = jnp.sum(e, axis=-1, keepdims=True)                    # (1, 1)
    # EUP reciprocal + one Newton step: stays off the VALU, keeps f32 accuracy.
    r = pl.reciprocal(den, approx=True)
    r = r * (2.0 - den * r)
    att = (float(HW) * r) * e                                   # (1, HW)

    # Channel std with Bessel correction (torch.std default unbiased=True).
    mu = jnp.mean(fs, axis=0, keepdims=True)                    # (1, HW)
    var = jnp.sum((fs - mu) ** 2, axis=0, keepdims=True) * (1.0 / (C - 1))
    sig = sigma * jnp.sqrt(var) * att                           # (1, HW)

    noisy = fs + nz * sig                                       # (C, HW)
    # Cast to bf16 BEFORE the (C, HW) -> (HW, C) transpose (XLU moves half the
    # vregs); emit flattened NHWC so the first conv consumes it directly.
    o_ref[0] = noisy.astype(o_ref.dtype).T


def add_attention_noise(f_s, f_t, noise, temp, sigma):
    N, C, H, W = f_s.shape
    HW = H * W
    kern = functools.partial(_noise_kernel, C=C, HW=HW, temp=temp, sigma=sigma)
    in_spec = pl.BlockSpec((1, C, HW), lambda n: (n, 0, 0))
    out_spec = pl.BlockSpec((1, HW, C), lambda n: (n, 0, 0))
    return pl.pallas_call(
        kern,
        out_shape=jax.ShapeDtypeStruct((N, HW, C), jnp.bfloat16),
        grid=(N,),
        in_specs=[in_spec, in_spec, in_spec],
        out_specs=out_spec,
        compiler_params=pltpu.CompilerParams(
            dimension_semantics=("parallel",),
            vmem_limit_bytes=_vmem_budget_bytes(),
        ),
    )(f_s.reshape(N, C, HW), f_t.reshape(N, C, HW), noise.reshape(N, C, HW))


# ------------------------------ 3x3 conv kernel -------------------------------
def _conv3x3_kernel(x_ref, w_ref, b_ref, o_ref, xpad_ref, col_ref, acc_ref,
                    *, H, W, Nb, tk, tn, relu, out_nchw, single_k):
    k = pl.program_id(2)
    M = Nb * H * W

    # Only the halo needs zeros; the interior is fully overwritten below every
    # step.  Zero the (bf16) scratch once per output block, not every step.
    @pl.when(k == 0)
    def _zero_pad():
        xpad_ref[...] = jnp.zeros_like(xpad_ref)

    # bf16 "same"-padded copy of this Cin tile (no casts: x is already bf16).
    # Interior sits at sublane offset 2 so the packed-bf16 store is pair-aligned.
    xpad_ref[:, 1:H + 1, 2:W + 2, :] = x_ref[...].astype(xpad_ref.dtype)

    # im2col: lay the 9 shifted taps side by side -> ONE MXU matmul with
    # K = 9*tk per grid step (accumulator touched once, not 9 times).
    for dy in range(3):
        for dx in range(3):
            t = dy * 3 + dx
            col_ref[:, t * tk:(t + 1) * tk] = (
                xpad_ref[:, dy:dy + H, dx + 1:dx + 1 + W, :].reshape(M, tk))

    # bf16 x bf16 -> f32 accumulate: MXU-native on v5e/v6e/v7x.
    contrib = jnp.dot(col_ref[...], w_ref[0],
                      preferred_element_type=jnp.float32)       # (M, tn)

    def _emit(acc):
        out = acc + b_ref[...]                                  # (M,tn)+(1,tn)
        if relu:
            out = jnp.maximum(out, 0.0)
        if out_nchw:
            # Single batched transpose -> lane-dense (tn, H*W) per image.
            o_ref[...] = jnp.swapaxes(out.reshape(Nb, H * W, tn), 1, 2
                                      ).astype(o_ref.dtype)
        else:
            o_ref[...] = out.reshape(Nb, H, W, tn).astype(o_ref.dtype)

    if single_k:
        _emit(contrib)      # Cin fits one tile: skip the accumulator round trip
    else:
        @pl.when(k == 0)
        def _first():
            acc_ref[...] = contrib

        @pl.when(k > 0)
        def _accumulate():
            acc_ref[...] += contrib

        @pl.when(k == pl.num_programs(2) - 1)
        def _finalize():
            _emit(acc_ref[...])


def _channel_tile(c):
    """Cout/Cin tile: full axis when small, else 256 (v6e/v7x MXU) or 128."""
    if c <= 256:
        return c
    for t in (256, 128):
        if c % t == 0:
            return t
    # Uncommon channel counts fall back to the full axis; this can get
    # VMEM-heavy -- the VMEM-aware _batch_tile keeps Nb=1 in that case.
    return c


def _conv_vmem_bytes(nb, H, W, tk, tn, out_bytes):
    m = nb * H * W
    return (2 * m * tk * 2                      # x blocks (bf16, double-buf)
            + 2 * 9 * tk * tn * 2               # weight blocks (bf16, double-buf)
            + 2 * m * tn * out_bytes            # output blocks (double-buf)
            + nb * (H + 2) * (W + 4) * tk * 2   # padded-input scratch (bf16)
            + m * 9 * tk * 2                    # im2col scratch (bf16)
            + m * tn * 4)                       # f32 accumulator


def _batch_tile(n, H, W, tk, tn, cout_tiles, out_bytes, budget, m_target=2048):
    """Fold images into the matmul M dim (up to ~m_target rows, VMEM aware)."""
    nb = 1
    while (nb < n and n % (2 * nb) == 0
           and 2 * nb * H * W <= m_target
           and _conv_vmem_bytes(2 * nb, H, W, tk, tn, out_bytes) <= budget):
        nb *= 2
    # Keep >= 2 blocks on the parallel grid axes so both TensorCores on v7x
    # (megacore sharding in general) get work.
    while nb > 1 and (n // nb) * cout_tiles < 2:
        nb //= 2
    return nb


def conv3x3_same(x_nhwc, w_hwio, bias, *, relu, out_layout, out_dtype):
    """3x3 'same' conv.  out_layout: 'nhwc' -> (N,H,W,Cout); 'nchw' -> (N,Cout,H*W)."""
    N, H, W, Cin = x_nhwc.shape
    Cout = w_hwio.shape[-1]
    tk = _channel_tile(Cin)
    tn = _channel_tile(Cout)
    nk = Cin // tk
    single_k = (nk == 1)
    out_nchw = (out_layout == "nchw")

    budget = _vmem_budget_bytes()
    out_bytes = jnp.dtype(out_dtype).itemsize
    Nb = _batch_tile(N, H, W, tk, tn, Cout // tn, out_bytes, budget)
    M = Nb * H * W
    grid = (N // Nb, Cout // tn, nk)            # reduction (Cin) axis last

    if out_nchw:
        out_shape = jax.ShapeDtypeStruct((N, Cout, H * W), out_dtype)
        out_spec = pl.BlockSpec((Nb, tn, H * W), lambda n, j, k: (n, j, 0))
    else:
        out_shape = jax.ShapeDtypeStruct((N, H, W, Cout), out_dtype)
        out_spec = pl.BlockSpec((Nb, H, W, tn), lambda n, j, k: (n, 0, 0, j))

    # Pre-reshape weights (tiny, wrapper side) so each Cin tile is a lane-dense
    # (9*tk, tn) block with K ordered (dy, dx, cin) -- matches the im2col.
    w_k = (w_hwio.astype(jnp.bfloat16)
           .reshape(3, 3, nk, tk, Cout)
           .transpose(2, 0, 1, 3, 4)
           .reshape(nk, 9 * tk, Cout))

    kern = functools.partial(_conv3x3_kernel, H=H, W=W, Nb=Nb, tk=tk, tn=tn,
                             relu=relu, out_nchw=out_nchw, single_k=single_k)
    acc_shape = (8, 128) if single_k else (M, tn)   # unused when single_k
    return pl.pallas_call(
        kern,
        out_shape=out_shape,
        grid=grid,
        in_specs=[
            pl.BlockSpec((Nb, H, W, tk), lambda n, j, k: (n, 0, 0, k)),
            pl.BlockSpec((1, 9 * tk, tn), lambda n, j, k: (k, 0, j)),
            pl.BlockSpec((1, tn), lambda n, j, k: (0, j)),
        ],
        out_specs=out_spec,
        scratch_shapes=[
            pltpu.VMEM((Nb, H + 2, W + 4, tk), jnp.bfloat16),   # padded Cin tile
            pltpu.VMEM((M, 9 * tk), jnp.bfloat16),              # im2col
            pltpu.VMEM(acc_shape, jnp.float32),                 # K accumulator
        ],
        compiler_params=pltpu.CompilerParams(
            dimension_semantics=("parallel", "parallel", "arbitrary"),
            vmem_limit_bytes=budget,
        ),
    )(x_nhwc, w_k, bias.reshape(1, Cout).astype(jnp.float32))


# ----------------------------- params + forward -------------------------------
def init_apr_params(key, base):
    """3 reconstruction blocks: Conv3x3(Cin->Cmid) -> ReLU -> Conv3x3(Cmid->Cin)."""
    chans = [(base * 4, base * 8), (base * 8, base * 16), (base * 16, base * 32)]
    params = []
    for cin, cmid in chans:
        key, k1, k2 = jax.random.split(key, 3)
        w1 = 0.05 * jax.random.normal(k1, (3, 3, cin, cmid), jnp.float32)
        b1 = jnp.zeros((cmid,), jnp.float32)
        w2 = 0.05 * jax.random.normal(k2, (3, 3, cmid, cin), jnp.float32)
        b2 = jnp.zeros((cin,), jnp.float32)
        params.append((w1, b1, w2, b2))
    return params


def apr_forward(f_s, f_t, noises, params, temp=0.5, sigma=0.1):
    """Pallas version of APR.forward. f_s / f_t / noises: lists of NCHW arrays."""
    # TODO(synk): torch.randn_like RNG cannot be reproduced bit-exactly; the
    # standard-normal noise is injected as an explicit input instead.
    f_rec = []
    for k in range(len(params)):
        N, C, H, W = f_s[k].shape
        noisy = add_attention_noise(f_s[k], f_t[k], noises[k], temp, sigma)
        x = noisy.reshape(N, H, W, C)            # contiguous (free) reshape
        w1, b1, w2, b2 = params[k]
        h = conv3x3_same(x, w1, b1, relu=True, out_layout="nhwc",
                         out_dtype=jnp.bfloat16)
        if H * W >= 128:
            # Lane-dense NCHW emitted straight from the kernel.
            y = conv3x3_same(h, w2, b2, relu=False, out_layout="nchw",
                             out_dtype=jnp.float32)
            y = y.reshape(N, C, H, W)            # contiguous (free) reshape
        else:
            # Tiny spatial dims: keep kernel stores lane-dense on Cout and let
            # XLA permute the small tensor.
            y = conv3x3_same(h, w2, b2, relu=False, out_layout="nhwc",
                             out_dtype=jnp.float32)
            y = jnp.transpose(y, (0, 3, 1, 2))
        f_rec.append(y)
    return f_rec


# ------------------- pure-JAX reference (correctness check) -------------------
def _ref_forward(f_s, f_t, noises, params, temp, sigma):
    """Reference emulating the kernel's bf16 MXU handoffs (weights, activations)."""
    outs = []
    dn = ('NCHW', 'HWIO', 'NCHW')

    def bf16_round(x):
        return x.astype(jnp.bfloat16).astype(jnp.float32)

    for k in range(len(params)):
        fs, ft, nz = f_s[k], f_t[k], noises[k]
        N, C, H, W = fs.shape
        fea = jnp.mean(jnp.abs(ft), axis=1, keepdims=True)
        att = (H * W) * jax.nn.softmax((fea / temp).reshape(N, -1), axis=1)
        att = att.reshape(N, 1, H, W)
        std = jnp.std(fs, axis=1, ddof=1, keepdims=True)
        noisy = bf16_round(fs + nz * (sigma * std * att))
        w1, b1, w2, b2 = params[k]
        h = jax.lax.conv_general_dilated(noisy, bf16_round(w1), (1, 1), 'SAME',
                                         dimension_numbers=dn,
                                         precision=jax.lax.Precision.HIGHEST)
        h = bf16_round(jax.nn.relu(h + b1[None, :, None, None]))
        y = jax.lax.conv_general_dilated(h, bf16_round(w2), (1, 1), 'SAME',
                                         dimension_numbers=dn,
                                         precision=jax.lax.Precision.HIGHEST)
        y = y + b2[None, :, None, None]
        outs.append(y)
    return outs


if __name__ == "__main__":
    base = 2                       # small synthetic config (PyTorch default: 64)
    temp, sigma = 0.5, 0.1
    N = 2
    spatial = [16, 8, 4]           # pyramid spatial sizes per level
    chans = [base * 4, base * 8, base * 16]

    key = jax.random.PRNGKey(0)
    key, kp = jax.random.split(key)
    params = init_apr_params(kp, base)

    f_s, f_t, noises = [], [], []
    for c, s in zip(chans, spatial):
        key, ks, kt, kn = jax.random.split(key, 4)
        f_s.append(jax.random.normal(ks, (N, c, s, s), jnp.float32))
        f_t.append(jax.random.normal(kt, (N, c, s, s), jnp.float32))
        noises.append(jax.random.normal(kn, (N, c, s, s), jnp.float32))

    out = apr_forward(f_s, f_t, noises, params, temp, sigma)
    out = jax.block_until_ready(out)

    ref = _ref_forward(f_s, f_t, noises, params, temp, sigma)
    for o, r in zip(out, ref):
        assert o.shape == r.shape and o.dtype == jnp.float32
        np.testing.assert_allclose(np.asarray(o), np.asarray(r),
                                   rtol=5e-3, atol=5e-3)

    print("KERNEL_OK")
</pallas_src>

<mosaic_0001>
module attributes {stable_mosaic.version = 11 : i64} {
  func.func @_noise_kernel(%arg0: i32, %arg1: memref<1x8x256xf32, #tpu.memory_space<vmem>>, %arg2: memref<1x8x256xf32, #tpu.memory_space<vmem>>, %arg3: memref<1x8x256xf32, #tpu.memory_space<vmem>>, %arg4: memref<1x256x8xbf16, #tpu.memory_space<vmem>>) attributes {dimension_semantics = [#tpu.dimension_semantics<parallel>], iteration_bounds = array<i64: 2>, scalar_prefetch = 0 : i64, scratch_operands = 0 : i64, tpu.core_type = #tpu.core_type<tc>, window_params = [{transform_indices = @transform_0, window_bounds = array<i64: 1, 8, 256>}, {transform_indices = @transform_1, window_bounds = array<i64: 1, 8, 256>}, {transform_indices = @transform_2, window_bounds = array<i64: 1, 8, 256>}, {transform_indices = @transform_3, window_bounds = array<i64: 1, 256, 8>}]} {
    %c0 = arith.constant 0 : index
    %c0_0 = arith.constant 0 : index
    %c0_1 = arith.constant 0 : index
    %0 = vector.load %arg1[%c0, %c0_0, %c0_1] : memref<1x8x256xf32, #tpu.memory_space<vmem>>, vector<1x8x256xf32>
    %1 = vector.shape_cast %0 : vector<1x8x256xf32> to vector<8x256xf32>
    %c0_2 = arith.constant 0 : index
    %c0_3 = arith.constant 0 : index
    %c0_4 = arith.constant 0 : index
    %2 = vector.load %arg2[%c0_2, %c0_3, %c0_4] : memref<1x8x256xf32, #tpu.memory_space<vmem>>, vector<1x8x256xf32>
    %3 = vector.shape_cast %2 : vector<1x8x256xf32> to vector<8x256xf32>
    %c0_5 = arith.constant 0 : index
    %c0_6 = arith.constant 0 : index
    %c0_7 = arith.constant 0 : index
    %4 = vector.load %arg3[%c0_5, %c0_6, %c0_7] : memref<1x8x256xf32, #tpu.memory_space<vmem>>, vector<1x8x256xf32>
    %5 = vector.shape_cast %4 : vector<1x8x256xf32> to vector<8x256xf32>
    %6 = math.absf %3 : vector<8x256xf32>
    %cst = arith.constant dense<0.000000e+00> : vector<256xf32>
    %7 = vector.multi_reduction <add>, %6, %cst [0] : vector<8x256xf32> to vector<256xf32>
    %8 = vector.shape_cast %7 : vector<256xf32> to vector<1x256xf32>
    %cst_8 = arith.constant 8.000000e+00 : f32
    %9 = vector.broadcast %cst_8 : f32 to vector<1x256xf32>
    %10 = arith.divf %8, %9 : vector<1x256xf32>
    %cst_9 = arith.constant 2.000000e+00 : f32
    %11 = vector.broadcast %cst_9 : f32 to vector<1x256xf32>
    %12 = arith.mulf %10, %11 : vector<1x256xf32>
    %13 = vector.shape_cast %12 : vector<1x256xf32> to vector<1x1x256xf32>
    %cst_10 = arith.constant dense<0xFF800000> : vector<1xf32>
    %14 = vector.multi_reduction <maximumf>, %13, %cst_10 [1, 2] : vector<1x1x256xf32> to vector<1xf32>
    %15 = vector.shape_cast %14 : vector<1xf32> to vector<1x1x1xf32>
    %16 = vector.extract %15[0, 0, 0] : f32 from vector<1x1x1xf32>
    %17 = vector.broadcast %16 : f32 to vector<1x256xf32>
    %18 = arith.subf %12, %17 : vector<1x256xf32>
    %19 = math.exp %18 : vector<1x256xf32>
    %cst_11 = arith.constant dense<0.000000e+00> : vector<1xf32>
    %20 = vector.multi_reduction <add>, %19, %cst_11 [1] : vector<1x256xf32> to vector<1xf32>
    %21 = vector.shape_cast %20 : vector<1xf32> to vector<1x1xf32>
    %22 = tpu.reciprocal %21 {approx = true} : vector<1x1xf32> -> vector<1x1xf32>
    %23 = arith.mulf %21, %22 : vector<1x1xf32>
    %cst_12 = arith.constant 2.000000e+00 : f32
    %24 = vector.broadcast %cst_12 : f32 to vector<1x1xf32>
    %25 = arith.subf %24, %23 : vector<1x1xf32>
    %26 = arith.mulf %22, %25 : vector<1x1xf32>
    %cst_13 = arith.constant 2.560000e+02 : f32
    %27 = vector.broadcast %cst_13 : f32 to vector<1x1xf32>
    %28 = arith.mulf %27, %26 : vector<1x1xf32>
    %29 = vector.broadcast %28 : vector<1x1xf32> to vector<1x256xf32>
    %30 = arith.mulf %29, %19 : vector<1x256xf32>
    %cst_14 = arith.constant dense<0.000000e+00> : vector<256xf32>
    %31 = vector.multi_reduction <add>, %1, %cst_14 [0] : vector<8x256xf32> to vector<256xf32>
    %32 = vector.shape_cast %31 : vector<256xf32> to vector<1x256xf32>
    %cst_15 = arith.constant 8.000000e+00 : f32
    %33 = vector.broadcast %cst_15 : f32 to vector<1x256xf32>
    %34 = arith.divf %32, %33 : vector<1x256xf32>
    %35 = vector.broadcast %34 : vector<1x256xf32> to vector<8x256xf32>
    %36 = arith.subf %1, %35 : vector<8x256xf32>
    %37 = arith.mulf %36, %36 : vector<8x256xf32>
    %cst_16 = arith.constant dense<0.000000e+00> : vector<256xf32>
    %38 = vector.multi_reduction <add>, %37, %cst_16 [0] : vector<8x256xf32> to vector<256xf32>
    %39 = vector.shape_cast %38 : vector<256xf32> to vector<1x256xf32>
    %cst_17 = arith.constant 0.142857149 : f32
    %40 = vector.broadcast %cst_17 : f32 to vector<1x256xf32>
    %41 = arith.mulf %39, %40 : vector<1x256xf32>
    %42 = math.sqrt %41 : vector<1x256xf32>
    %cst_18 = arith.constant 1.000000e-01 : f32
    %43 = vector.broadcast %cst_18 : f32 to vector<1x256xf32>
    %44 = arith.mulf %43, %42 : vector<1x256xf32>
    %45 = arith.mulf %44, %30 : vector<1x256xf32>
    %46 = vector.broadcast %45 : vector<1x256xf32> to vector<8x256xf32>
    %47 = arith.mulf %5, %46 : vector<8x256xf32>
    %48 = arith.addf %1, %47 : vector<8x256xf32>
    %49 = arith.truncf %48 : vector<8x256xf32> to vector<8x256xbf16>
    %50 = tpu.transpose %49, [1, 0] : vector<8x256xbf16> -> vector<256x8xbf16>
    %c0_19 = arith.constant 0 : index
    %c0_20 = arith.constant 0 : index
    %c0_21 = arith.constant 0 : index
    %51 = vector.load %arg4[%c0_19, %c0_20, %c0_21] : memref<1x256x8xbf16, #tpu.memory_space<vmem>>, vector<1x256x8xbf16>
    %52 = vector.shape_cast %51 : vector<1x256x8xbf16> to vector<256x8xbf16>
    %53 = vector.shape_cast %50 : vector<256x8xbf16> to vector<1x256x8xbf16>
    tpu.vector_store %arg4[%c0_19, %c0_20, %c0_21], %53 {strides = array<i32>} : memref<1x256x8xbf16, #tpu.memory_space<vmem>>, vector<1x256x8xbf16>,
    return
  }
  func.func @transform_0(%arg0: i32) -> (i32, i32, i32) {
    %c0_i32 = arith.constant 0 : i32
    %c0_i32_0 = arith.constant 0 : i32
    %c0_i32_1 = arith.constant 0 : i32
    return %arg0, %c0_i32, %c0_i32_0 : i32, i32, i32
  }
  func.func @transform_1(%arg0: i32) -> (i32, i32, i32) {
    %c0_i32 = arith.constant 0 : i32
    %c0_i32_0 = arith.constant 0 : i32
    %c0_i32_1 = arith.constant 0 : i32
    return %arg0, %c0_i32, %c0_i32_0 : i32, i32, i32
  }
  func.func @transform_2(%arg0: i32) -> (i32, i32, i32) {
    %c0_i32 = arith.constant 0 : i32
    %c0_i32_0 = arith.constant 0 : i32
    %c0_i32_1 = arith.constant 0 : i32
    return %arg0, %c0_i32, %c0_i32_0 : i32, i32, i32
  }
  func.func @transform_3(%arg0: i32) -> (i32, i32, i32) {
    %c0_i32 = arith.constant 0 : i32
    %c0_i32_0 = arith.constant 0 : i32
    %c0_i32_1 = arith.constant 0 : i32
    return %arg0, %c0_i32, %c0_i32_0 : i32, i32, i32
  }
}

</mosaic_0001>

<bundles_post_ra>
// kernel: tpu_custom_call.1
= control target key start
LH: loop header
LB: loop body
LE: loop exit
PB: predicated region body
PF: predicated region fallthrough
CT: control target
= control target key end

     0   :  { %8 = vsyncpa [#allocation3], 0  ;;  %s1176_s0 = inlined_call_operand.hbm [shape: f32[2,8,256], index: 0, kind: input, shape index: {}]   ;;  %s1177_s1 = inlined_call_operand.hbm [shape: f32[2,8,256], index: 1, kind: input, shape index: {}]   ;;  %s1178_s2 = inlined_call_operand.hbm [shape: f32[2,8,256], index: 2, kind: input, shape index: {}]   ;;  %s1179_s3 = inlined_call_operand.vmem [shape: bf16[2,256,8], index: 3, kind: output, shape index: {}]  }
   0x1   :  { %10 = vsyncpa [#allocation3 + $0x1], 0 }
   0x2   :  { %11 = vsyncpa [#allocation5], 0 }
   0x3   :  { %13 = vsyncpa [#allocation5 + $0x1], 0  ;;  %s917_s12 = smov 0   ;;  %s919_s13 = smov 0  }
   0x4   :  { %s921_s14 = smov 0   ;;  %s923_s15 = smov 0  }
   0x5 LB: > { %s936_s16 = sadd.s32 4294967295, %s892_s15   ;;  %s939_s17 = sadd.s32 1, %s892_s15   ;;  %s892_s15 = sphi %s923_s15, %s1192_s15   ;;  %s888_s14 = sphi %s921_s14, %s1191_s14   ;;  %s884_s13 = sphi %s919_s13, %s1190_s13   ;;  %s880_s12 = sphi %s917_s12, %s1189_s12  }
   0x6   : > { %s23_s18 = ssub.s32 %s892_s15, %s939_s17  ;;  %s26_s19 = sadd.s32 1, %s888_s14 }
   0x7   : > { %p24_p0 = scmp.eq.s32.totalorder %s23_s18, 0  ;;  %p33_p1 = scmp.ne.s32.totalorder %s888_s14, %s884_s13 }
   0x8   : > { %p34_p2 = scmp.eq.s32.totalorder %s892_s15, 0  ;;  %p39_p3 = scmp.ne.s32.totalorder %s884_s13, %s880_s12 }
   0x9   : > { %s949_s20 = scalar_select %p24_p0, %s888_s14, %s26_s19  }
   0xa   : > { %p35_p4 = por %p34_p2, %p33_p1  ;;  %p40_p5 = scmp.eq.s32.totalorder %s936_s16, 0 }
   0xb   : > { %p726_p6 = scmp.lt.s32.totalorder %s892_s15, 2  ;;  %s141_s22 = sand.u32 1, %s888_s14  }
   0xc   : > { %p953_p7 = por %p40_p5, %p39_p3  ;;  %s960_s23 = sshll.u32 %s141_s22, 4 }
   0xd   : > { %s963_s24 = sshll.u32 %s892_s15, 8  ;;  %p965_p8 = pnand %p726_p6, %p35_p4 }
   0xe   : > { %s1181_s21 = scalar_select %p953_p7, 1, 0 }
   0xf   : > { %s160_s26 = sand.u32 1, %s892_s15   ;;  %s974_s29 = scalar_lea.hbm %s1177_s1, %s963_s24 }
  0x10   : > { %s164_s30 = scalar_lea.vmem [#allocation4], %s960_s23  ;;  %s979_s5 = scalar_lea.sflag [#allocation5], %s160_s26 }
  0x11   : > { %s172_s4 = sshll.u32 %s164_s30, 4  ;;  %s770_s6 = scalar_lea.hbm %s974_s29, 256  ;;  %s173_s4 = int_to_ptr.vmem [resolvable:$true] %s172_s4 }
  0x12   : > { %p771_p11 = scmp.ne.s32.totalorder %s974_s29, %s770_s6  ;;  %p985_p12 = pneg %p965_p8 }
  0x13   : > { %s775_s10 = scalar_lea.hbm %s1177_s1, 512  ;;  %p776_p1 = scmp.lt.s32.totalorder %s974_s29, %s1177_s1 }
  0x14   : > { %p773_p13 = pnand %p985_p12, %p771_p11  ;;  %p777_p2 = scmp.lt.s32.totalorder %s775_s10, %s770_s6 }
  0x16   : > { %p774_p0 = pneg %p773_p13  ;;  %p778_p3 = por %p777_p2, %p776_p1 }
  0x18   : > { %p779_p4 = pnand %p778_p3, %p774_p0 }
  0x1a   : > { %782 = shalt.err (!%p779_p4)
}
  0x1b   : > { %s783_s18 = scalar_lea.vmem %s173_s4, 256  ;;  %s894_s19 = smov [#allocation4]  }
  0x1c   : > { %p784_p5 = scmp.ne.s32.totalorder %s173_s4, %s783_s18  ;;  %s788_s26 = sshll.u32 %s894_s19, 4  ;;  %s789_s26 = int_to_ptr.vmem [resolvable:$false] %s788_s26 }
  0x1d   : > { %s790_s27 = scalar_lea.vmem %s789_s26, 512  ;;  %p791_p11 = scmp.lt.s32.totalorder %s173_s4, %s789_s26 }
  0x1e   : > { %p786_p6 = pnand %p784_p5, %p985_p12  ;;  %p792_p13 = scmp.lt.s32.totalorder %s790_s27, %s783_s18 }
  0x20   : > { %p787_p9 = pneg %p786_p6  ;;  %p793_p10 = por %p792_p13, %p791_p11 }
  0x22   : > { %p794_p7 = pnand %p793_p10, %p787_p9 }
  0x24   : > { %797 = shalt.err (!%p794_p7)
}
  0x25   : > { %722 = dma.hbm_to_vmem [thread:$0]  (!%p965_p8), %s974_s29, 256, %s173_s4, %s979_s5  }
  0x26   : > { %p1184_p0 = scmp.lt.s32.totalorder %s892_s15, 3  ;;  %p1185_p1 = scmp.ge.s32.totalorder %s892_s15, 1 }
  0x27   : > { %s1016_s8 = scalar_lea.hbm %s1176_s0, %s963_s24  ;;  %s145_s9 = scalar_lea.vmem [#allocation2], %s960_s23 }
  0x28   : > { %p1008_p2 = pnand %p1185_p1, %p1184_p0  ;;  %s153_s10 = sshll.u32 %s145_s9, 4  ;;  %s154_s10 = int_to_ptr.vmem [resolvable:$true] %s153_s10 }
  0x29   : > { %s1023_s29 = scalar_lea.hbm %s1178_s2, %s963_s24  ;;  %s142_s15 = scalar_lea.sflag [#allocation3], %s141_s22 }
  0x2a   : > { %s1186_s28 = scalar_select %p1008_p2, 1, 0 }
  0x2b   : > { %s798_s4 = scalar_lea.hbm %s1016_s8, 256  ;;  %s803_s26 = scalar_lea.hbm %s1176_s0, 512 }
  0x2c   : > { %p799_p7 = scmp.ne.s32.totalorder %s1016_s8, %s798_s4  ;;  %p804_p3 = scmp.lt.s32.totalorder %s1016_s8, %s1176_s0 }
  0x2d   : > { %p805_p4 = scmp.lt.s32.totalorder %s803_s26, %s798_s4 }
  0x2e   : > { %p801_p9 = pnand %p799_p7, %p985_p12 }
  0x2f   : > { %p806_p5 = por %p805_p4, %p804_p3 }
  0x30   : > { %p802_p10 = pneg %p801_p9 }
  0x32   : > { %p807_p6 = pnand %p806_p5, %p802_p10 }
  0x34   : > { %810 = shalt.err (!%p807_p6)
}
  0x35   : > { %s811_s24 = scalar_lea.vmem %s154_s10, 256  ;;  %s895_s22 = smov [#allocation2]  }
  0x36   : > { %p812_p11 = scmp.ne.s32.totalorder %s154_s10, %s811_s24  ;;  %s816_s6 = sshll.u32 %s895_s22, 4  ;;  %s817_s6 = int_to_ptr.vmem [resolvable:$false] %s816_s6 }
  0x37   : > { %s818_s9 = scalar_lea.vmem %s817_s6, 512  ;;  %p819_p1 = scmp.lt.s32.totalorder %s154_s10, %s817_s6 }
  0x38   : > { %p814_p13 = pnand %p812_p11, %p985_p12  ;;  %p820_p7 = scmp.lt.s32.totalorder %s818_s9, %s811_s24 }
  0x3a   : > { %p815_p0 = pneg %p814_p13  ;;  %p821_p9 = por %p820_p7, %p819_p1 }
  0x3c   : > { %p822_p2 = pnand %p821_p9, %p815_p0 }
  0x3e   : > { %825 = shalt.err (!%p822_p2)
}
  0x3f   : > { %719 = dma.hbm_to_vmem [thread:$0]  (!%p965_p8), %s1016_s8, 256, %s154_s10, %s142_s15  }
  0x40   : > { %s183_s11 = scalar_lea.vmem [#allocation6], %s960_s23  ;;  %s826_s4 = scalar_lea.hbm %s1023_s29, 256 }
  0x41   : > { %s191_s12 = sshll.u32 %s183_s11, 4  ;;  %p827_p10 = scmp.ne.s32.totalorder %s1023_s29, %s826_s4  ;;  %s192_s12 = int_to_ptr.vmem [resolvable:$true] %s191_s12 }
  0x42   : > { %s831_s26 = scalar_lea.hbm %s1178_s2, 512  ;;  %p832_p2 = scmp.lt.s32.totalorder %s1023_s29, %s1178_s2 }
  0x43   : > { %p829_p3 = pnand %p827_p10, %p985_p12  ;;  %p833_p5 = scmp.lt.s32.totalorder %s831_s26, %s826_s4 }
  0x45   : > { %p830_p4 = pneg %p829_p3  ;;  %p834_p6 = por %p833_p5, %p832_p2 }
  0x47   : > { %p835_p11 = pnand %p834_p6, %p830_p4 }
  0x49   : > { %838 = shalt.err (!%p835_p11)
}
  0x4a   : > { %s839_s23 = scalar_lea.vmem %s192_s12, 256  ;;  %s896_s8 = smov [#allocation6]  }
  0x4b   : > { %p840_p13 = scmp.ne.s32.totalorder %s192_s12, %s839_s23  ;;  %s844_s10 = sshll.u32 %s896_s8, 4  ;;  %s845_s10 = int_to_ptr.vmem [resolvable:$false] %s844_s10 }
  0x4c   : > { %s846_s15 = scalar_lea.vmem %s845_s10, 512  ;;  %p847_p7 = scmp.lt.s32.totalorder %s192_s12, %s845_s10 }
  0x4d   : > { %p842_p0 = pnand %p840_p13, %p985_p12  ;;  %p848_p9 = scmp.lt.s32.totalorder %s846_s15, %s839_s23 }
  0x4f   : > { %p843_p1 = pneg %p842_p0  ;;  %p849_p10 = por %p848_p9, %p847_p7 }
  0x51   : > { %p850_p3 = pnand %p849_p10, %p843_p1 }
  0x53   : > { %853 = shalt.err (!%p850_p3)
}
  0x54   : > { %725 = dma.hbm_to_vmem [thread:$0]  (!%p965_p8), %s1023_s29, 256, %s192_s12, %s979_s5  }
  0x55   : > { %p1187_p4 = scmp.ne.s32.totalorder %s1186_s28, 0 }
  0x56   : > { %s202_s7 = sand.u32 (!%p1187_p4), 1, %s884_s13   ;;  %p1188_p12 = scmp.ne.s32.totalorder (!%p1187_p4), %s1181_s21, 0 }
  0x57   : > { %200 = sbr.rel (%p1187_p4) target bundleno = 659 (0x293), region = 32  ;;  %s1064_s24 = sshll.u32 (!%p1187_p4), %s202_s7, 4 }
  0x58   : > { %s203_s22 = scalar_lea.sflag (!%p1187_p4), [#allocation3], %s202_s7  ;;  %s206_s6 = scalar_lea.vmem (!%p1187_p4), [#allocation2], %s1064_s24 }
  0x5c   : > { %871 = dma.done.wait (%p1188_p12), %s203_s22, 256  }
  0x5d   : > { %873 = vsyncadd (%p1188_p12), %s203_s22, 4294967040  ;;  %s211_s25 = sand.u32 1, %s936_s16   ;;  %s215_s28 = scalar_lea.vmem [#allocation4], %s1064_s24 }
  0x5e   : > { %s212_s5 = scalar_lea.sflag [#allocation5], %s211_s25 }
  0x5f   : > { %875 = dma.done.wait (%p1188_p12), %s212_s5, 512  }
  0x60   : > { %877 = vsyncadd (%p1188_p12), %s212_s5, 4294966784  ;;  %v265_v0 = vld [vmem:[%s215_s28] sm:$0xff]  ;;  %v266_v1 = vld [vmem:[%s215_s28 + $0x8] sm:$0xff]  ;;  %s224_s29 = scalar_lea.vmem [#allocation6], %s1064_s24  ;;  %p257_p8 = scmp.lt.s32.totalorder %s936_s16, 1  ;;  %vm509_vm4 = vcmask 60416  }
  0x61   : > { %v269_v2 = vand.u32 2147483647, %v265_v0  ;;  %v270_v3 = vand.u32 2147483647, %v266_v1  ;;  %v263_v30 = vld [vmem:[%s206_s6] sm:$0xff]  ;;  %v1084_v37 = vld [vmem:[%s206_s6 + $0x8] sm:$0xff] }
  0x62   : > { %v309_v31 = vrot.slane %v263_v30, 4  ;;  %v315_v38 = vrot.slane %v1084_v37, 4  ;;  %s1194_s16 = smov (!%p257_p8, %s936_s16), 1 }
  0x63   : > { %v271_v4 = vrot.slane %v269_v2, 4  ;;  %v277_v5 = vrot.slane %v270_v3, 4  ;;  %s707_s9 = sshll.u32 %s1194_s16, 7 }
  0x64   : > { %v310_v32 = vadd.f32 %v309_v31, %v263_v30  ;;  %v316_v40 = vadd.f32 %v315_v38, %v1084_v37  ;;  %s1097_s4 = scalar_lea.vmem %s1179_s3, %s707_s9 }
  0x65   : > { %v272_v6 = vadd.f32 %v271_v4, %v269_v2  ;;  %v278_v7 = vadd.f32 %v277_v5, %v270_v3 }
  0x66   : > { %v311_v33 = vrot.slane %v310_v32, 2  ;;  %v317_v42 = vrot.slane %v316_v40, 2 }
  0x67   : > { %v273_v8 = vrot.slane %v272_v6, 2  ;;  %v279_v9 = vrot.slane %v278_v7, 2 }
  0x68   : > { %v312_v34 = vadd.f32 %v311_v33, %v310_v32  ;;  %v318_v44 = vadd.f32 %v317_v42, %v316_v40 }
  0x69   : > { %v274_v10 = vadd.f32 %v273_v8, %v272_v6  ;;  %v280_v11 = vadd.f32 %v279_v9, %v278_v7 }
  0x6a   : > { %v313_v35 = vrot.slane %v312_v34, 1  ;;  %v319_v46 = vrot.slane %v318_v44, 1 }
  0x6b   : > { %v275_v12 = vrot.slane %v274_v10, 1  ;;  %v281_v13 = vrot.slane %v280_v11, 1 }
  0x6c   : > { %v314_v36 = vadd.f32 %v313_v35, %v312_v34  ;;  %v320_v48 = vadd.f32 %v319_v46, %v318_v44 }
  0x6d   : > { %v276_v14 = vadd.f32 %v275_v12, %v274_v10  ;;  %v282_v15 = vadd.f32 %v281_v13, %v280_v11  ;;  %v267_v13 = vld [vmem:[%s224_s29] sm:$0xff] }
  0x6e   : > { %v321_v39 = vmul.f32 0.125, %v314_v36  ;;  %v322_v50 = vmul.f32 0.125, %v320_v48 }
  0x6f   : > { %v284_v16 = vmul.f32 0.125, %v276_v14  ;;  %v285_v17 = vmul.f32 0.125, %v282_v15 }
  0x70   : > { %v323_v41 = vsub.f32 %v263_v30, %v321_v39  ;;  %v324_v52 = vsub.f32 %v1084_v37, %v322_v50 }
  0x71   : > { %v286_v18 = vmul.f32 2.0, %v284_v16  ;;  %v287_v19 = vmul.f32 2.0, %v285_v17 }
  0x72   : > { %v325_v43 = vmul.f32 %v323_v41, %v323_v41  ;;  %v326_v54 = vmul.f32 %v324_v52, %v324_v52 }
  0x73   : > { %v288_v20 = vmax.f32 %v286_v18, %v287_v19 }
  0x74   : > { %v327_v45 = vrot.slane %v325_v43, 4  ;;  %v333_v56 = vrot.slane %v326_v54, 4 }
  0x75   : > { %289 = vmax.xlane.f32.xlu0 %v288_v20 }
  0x76   : > { %v328_v47 = vadd.f32 %v327_v45, %v325_v43  ;;  %v334_v58 = vadd.f32 %v333_v56, %v326_v54 }
  0x78   : > { %v329_v49 = vrot.slane %v328_v47, 2  ;;  %v335_v59 = vrot.slane %v334_v58, 2 }
  0x7a   : > { %v330_v51 = vadd.f32 %v329_v49, %v328_v47  ;;  %v336_v61 = vadd.f32 %v335_v59, %v334_v58 }
  0x7c   : > { %v331_v53 = vrot.slane %v330_v51, 1  ;;  %v337_v62 = vrot.slane %v336_v61, 1 }
  0x7e   : > { %v332_v55 = vadd.f32 %v331_v53, %v330_v51  ;;  %v338_v0 = vadd.f32 %v337_v62, %v336_v61 }
  0x80   : > { %v339_v57 = vmul.f32 0.14285715, %v332_v55  ;;  %v340_v4 = vmul.f32 0.14285715, %v338_v0 }
  0x82   : > { %vm343_vm0 = vcmp.eq.f32.partialorder %v339_v57, inf  ;;  %v346_v3 = vand.u32 2147483648, %v339_v57  ;;  %vm345_vm1 = vcmp.eq.f32.partialorder %v339_v57, 0.0  ;;  %vm350_vm2 = vcmp.eq.f32.partialorder %v340_v4, inf }
  0x83   : > { %v353_v20 = vand.u32 2147483648, %v340_v4  ;;  %vm352_vm3 = vcmp.eq.f32.partialorder %v340_v4, 0.0 }
  0xfe   : > { %v290_v21 = vpop.xlane.xlu0 %289 }
  0xff   : > { %708 = vpush %v290_v21 }
 0x130   : > { %s709_s21 = spop %708 }
 0x131   : > { %v292_v22 = vstv %s709_s21 }
 0x132   : > { %v293_v23 = vsub.f32 %v286_v18, %v292_v22  ;;  %v294_v24 = vsub.f32 %v287_v19, %v292_v22 }
 0x134   : > { %v295_v25 = vmul.f32 1.442695, %v293_v23  ;;  %v297_v26 = vmul.f32 1.442695, %v294_v24 }
 0x136   : > { %760 = vpow2.f32 %v295_v25 }
 0x137   : > { %762 = vpow2.f32 %v297_v26  ;;  %v268_v26 = vld [vmem:[%s224_s29 + $0x8] sm:$0xff] }
 0x138   : > { %764 = vrsqrt.f32 %v339_v57 }
 0x143   : > { %v761_v27 = vpop.eup %760 }
 0x144   : > { %v1077_v28 = vpop.eup %762 }
 0x145   : > { %v299_v29 = vadd.f32 %v1077_v28, %v761_v27  ;;  %v765_v63 = vpop.eup %764 }
 0x146   : > { %v342_v1 = vmul.f32 %v765_v63, %v339_v57 }
 0x147   : > { %300 = vadd.xlane.f32.xlu0 %v299_v29 }
 0x148   : > { %v344_v6 = vsel %vm343_vm0, %v339_v57, %v342_v1 }
 0x149   : > { %v347_v8 = vsel %vm345_vm1, %v346_v3, %v344_v6 }
 0x14a   : > { %v355_v11 = vmul.f32 0.1, %v347_v8 }
 0x1d0   : > { %v301_v60 = vpop.xlane.xlu0 %300 }
 0x1d1   : > { %766 = vrcp.f32 %v301_v60 }
 0x1d2   : > { %768 = vrsqrt.f32 %v340_v4 }
 0x1de   : > { %v767_v2 = vpop.eup %766 }
 0x1df   : > { %v303_v5 = vmul.f32 %v767_v2, %v301_v60  ;;  %v769_v17 = vpop.eup %768 }
 0x1e0   : > { %v349_v19 = vmul.f32 %v769_v17, %v340_v4 }
 0x1e1   : > { %v304_v7 = vsub.f32 2.0, %v303_v5 }
 0x1e2   : > { %v351_v21 = vsel %vm350_vm2, %v340_v4, %v349_v19 }
 0x1e3   : > { %v305_v9 = vmul.f32 %v767_v2, %v304_v7  ;;  %v354_v22 = vsel %vm352_vm3, %v353_v20, %v351_v21 }
 0x1e4   : > { %v356_v24 = vmul.f32 0.1, %v354_v22 }
 0x1e5   : > { %v306_v10 = vmul.f32 256.0, %v305_v9 }
 0x1e7   : > { %v307_v12 = vmul.f32 %v761_v27, %v306_v10  ;;  %v308_v23 = vmul.f32 %v1077_v28, %v306_v10 }
 0x1e9   : > { %v357_v14 = vmul.f32 %v355_v11, %v307_v12  ;;  %v358_v25 = vmul.f32 %v356_v24, %v308_v23 }
 0x1eb   : > { %v359_v15 = vmul.f32 %v357_v14, %v267_v13  ;;  %v360_v27 = vmul.f32 %v358_v25, %v268_v26 }
 0x1ed   : > { %v361_v16 = vadd.f32 %v359_v15, %v263_v30  ;;  %v362_v29 = vadd.f32 %v360_v27, %v1084_v37 }
 0x1ef   : > { %v363_v18 = vpack.c.bf16 %v361_v16, %v361_v16  ;;  %v364_v30 = vpack.c.bf16 %v362_v29, %v362_v29 }
 0x1f1   : > { %365 = vxpose.xlu1.c.b16.start.end [1/1] (short) %v363_v18, 128 }
 0x20e   : > { %381 = vxpose.xlu1.c.b16.start.end [1/1] (short) %v364_v30, 128 }
 0x253   : > { %v373_v28 = vpop.trf.xlu1 }
 0x254   : > { %v670_v31 = vcombine.low %v373_v28, %v373_v28  ;;  %v671_v32 = vcombine.high %v373_v28, %v373_v28 }
 0x256   : > { %510 = vst.msk [vmem:[%s1097_s4] sm:$0xf] %vm509_vm4, %v670_v31  ;;  %511 = vst.msk [vmem:[%s1097_s4 + $0x4] sm:$0xf] %vm509_vm4, %v671_v32 }
 0x257   : > { %v374_v33 = vpop.trf.xlu1 }
 0x258   : > { %v672_v34 = vcombine.low %v374_v33, %v374_v33  ;;  %v673_v35 = vcombine.high %v374_v33, %v374_v33 }
 0x25a   : > { %512 = vst.msk [vmem:[%s1097_s4 + $0x8] sm:$0xf] %vm509_vm4, %v672_v34  ;;  %513 = vst.msk [vmem:[%s1097_s4 + $0xc] sm:$0xf] %vm509_vm4, %v673_v35 }
 0x25b   : > { %v375_v36 = vpop.trf.xlu1 }
 0x25c   : > { %v674_v37 = vcombine.low %v375_v36, %v375_v36  ;;  %v675_v38 = vcombine.high %v375_v36, %v375_v36 }
 0x25e   : > { %514 = vst.msk [vmem:[%s1097_s4 + $0x10] sm:$0xf] %vm509_vm4, %v674_v37  ;;  %515 = vst.msk [vmem:[%s1097_s4 + $0x14] sm:$0xf] %vm509_vm4, %v675_v38 }
 0x25f   : > { %v376_v39 = vpop.trf.xlu1 }
 0x260   : > { %v676_v40 = vcombine.low %v376_v39, %v376_v39  ;;  %v677_v41 = vcombine.high %v376_v39, %v376_v39 }
 0x262   : > { %516 = vst.msk [vmem:[%s1097_s4 + $0x18] sm:$0xf] %vm509_vm4, %v676_v40  ;;  %517 = vst.msk [vmem:[%s1097_s4 + $0x1c] sm:$0xf] %vm509_vm4, %v677_v41 }
 0x263   : > { %v377_v42 = vpop.trf.xlu1 }
 0x264   : > { %v678_v43 = vcombine.low %v377_v42, %v377_v42  ;;  %v679_v44 = vcombine.high %v377_v42, %v377_v42 }
 0x266   : > { %518 = vst.msk [vmem:[%s1097_s4 + $0x20] sm:$0xf] %vm509_vm4, %v678_v43  ;;  %519 = vst.msk [vmem:[%s1097_s4 + $0x24] sm:$0xf] %vm509_vm4, %v679_v44 }
 0x267   : > { %v378_v45 = vpop.trf.xlu1 }
 0x268   : > { %v680_v46 = vcombine.low %v378_v45, %v378_v45  ;;  %v681_v47 = vcombine.high %v378_v45, %v378_v45 }
 0x26a   : > { %520 = vst.msk [vmem:[%s1097_s4 + $0x28] sm:$0xf] %vm509_vm4, %v680_v46  ;;  %521 = vst.msk [vmem:[%s1097_s4 + $0x2c] sm:$0xf] %vm509_vm4, %v681_v47 }
 0x26b   : > { %v379_v48 = vpop.trf.xlu1 }
 0x26c   : > { %v682_v49 = vcombine.low %v379_v48, %v379_v48  ;;  %v683_v50 = vcombine.high %v379_v48, %v379_v48 }
 0x26e   : > { %522 = vst.msk [vmem:[%s1097_s4 + $0x30] sm:$0xf] %vm509_vm4, %v682_v49  ;;  %523 = vst.msk [vmem:[%s1097_s4 + $0x34] sm:$0xf] %vm509_vm4, %v683_v50 }
 0x26f   : > { %v380_v51 = vpop.trf.xlu1 }
 0x270   : > { %v684_v52 = vcombine.low %v380_v51, %v380_v51  ;;  %v685_v53 = vcombine.high %v380_v51, %v380_v51 }
 0x272   : > { %524 = vst.msk [vmem:[%s1097_s4 + $0x38] sm:$0xf] %vm509_vm4, %v684_v52  ;;  %525 = vst.msk [vmem:[%s1097_s4 + $0x3c] sm:$0xf] %vm509_vm4, %v685_v53 }
 0x273   : > { %v389_v54 = vpop.trf.xlu1 }
 0x274   : > { %v686_v55 = vcombine.low %v389_v54, %v389_v54  ;;  %v687_v56 = vcombine.high %v389_v54, %v389_v54 }
 0x276   : > { %526 = vst.msk [vmem:[%s1097_s4 + $0x40] sm:$0xf] %vm509_vm4, %v686_v55  ;;  %527 = vst.msk [vmem:[%s1097_s4 + $0x44] sm:$0xf] %vm509_vm4, %v687_v56 }
 0x277   : > { %v390_v57 = vpop.trf.xlu1 }
 0x278   : > { %v688_v58 = vcombine.low %v390_v57, %v390_v57  ;;  %v689_v59 = vcombine.high %v390_v57, %v390_v57 }
 0x27a   : > { %528 = vst.msk [vmem:[%s1097_s4 + $0x48] sm:$0xf] %vm509_vm4, %v688_v58  ;;  %529 = vst.msk [vmem:[%s1097_s4 + $0x4c] sm:$0xf] %vm509_vm4, %v689_v59 }
 0x27b   : > { %v391_v60 = vpop.trf.xlu1 }
 0x27c   : > { %v690_v61 = vcombine.low %v391_v60, %v391_v60  ;;  %v691_v62 = vcombine.high %v391_v60, %v391_v60 }
 0x27e   : > { %530 = vst.msk [vmem:[%s1097_s4 + $0x50] sm:$0xf] %vm509_vm4, %v690_v61  ;;  %531 = vst.msk [vmem:[%s1097_s4 + $0x54] sm:$0xf] %vm509_vm4, %v691_v62 }
 0x27f   : > { %v392_v63 = vpop.trf.xlu1 }
 0x280   : > { %v692_v0 = vcombine.low %v392_v63, %v392_v63  ;;  %v693_v1 = vcombine.high %v392_v63, %v392_v63 }
 0x282   : > { %532 = vst.msk [vmem:[%s1097_s4 + $0x58] sm:$0xf] %vm509_vm4, %v692_v0  ;;  %533 = vst.msk [vmem:[%s1097_s4 + $0x5c] sm:$0xf] %vm509_vm4, %v693_v1 }
 0x283   : > { %v393_v2 = vpop.trf.xlu1 }
 0x284   : > { %v694_v3 = vcombine.low %v393_v2, %v393_v2  ;;  %v695_v4 = vcombine.high %v393_v2, %v393_v2 }
 0x286   : > { %534 = vst.msk [vmem:[%s1097_s4 + $0x60] sm:$0xf] %vm509_vm4, %v694_v3  ;;  %535 = vst.msk [vmem:[%s1097_s4 + $0x64] sm:$0xf] %vm509_vm4, %v695_v4 }
 0x287   : > { %v394_v5 = vpop.trf.xlu1 }
 0x288   : > { %v696_v6 = vcombine.low %v394_v5, %v394_v5  ;;  %v697_v7 = vcombine.high %v394_v5, %v394_v5 }
 0x28a   : > { %536 = vst.msk [vmem:[%s1097_s4 + $0x68] sm:$0xf] %vm509_vm4, %v696_v6  ;;  %537 = vst.msk [vmem:[%s1097_s4 + $0x6c] sm:$0xf] %vm509_vm4, %v697_v7 }
 0x28b   : > { %v395_v8 = vpop.trf.xlu1 }
 0x28c   : > { %v698_v9 = vcombine.low %v395_v8, %v395_v8  ;;  %v699_v10 = vcombine.high %v395_v8, %v395_v8 }
 0x28e   : > { %538 = vst.msk [vmem:[%s1097_s4 + $0x70] sm:$0xf] %vm509_vm4, %v698_v9  ;;  %539 = vst.msk [vmem:[%s1097_s4 + $0x74] sm:$0xf] %vm509_vm4, %v699_v10 }
 0x28f   : > { %v396_v11 = vpop.trf.xlu1 }
 0x290   : > { %v700_v12 = vcombine.low %v396_v11, %v396_v11  ;;  %v701_v13 = vcombine.high %v396_v11, %v396_v11 }
 0x292   : > { %540 = vst.msk [vmem:[%s1097_s4 + $0x78] sm:$0xf] %vm509_vm4, %v700_v12  ;;  %541 = vst.msk [vmem:[%s1097_s4 + $0x7c] sm:$0xf] %vm509_vm4, %v701_v13 }
 0x293 PF: > { %p16_p2 = scmp.ge.s32.totalorder %s939_s17, 4   ;;  %s1189_s12 = smov %s884_s13 }
 0x294   : > { %s1190_s13 = smov %s888_s14  ;;  %s1191_s14 = smov %s949_s20 }
 0x295   : > { %s1192_s15 = smov %s939_s17  ;;  %18 = sbr.rel (!%p16_p2) target bundleno = 5 (0x5), region = 96 }
 0x29a   :  { %563 = vsyncpa [#allocation3], 1 }
 0x29b   :  { %565 = vsyncpa [#allocation3 + $0x1], 1 }
 0x29c   :  { %566 = vsyncpa [#allocation5], 1 }
 0x29d   :  { %568 = vsyncpa [#allocation5 + $0x1], 1 }

</bundles_post_ra>
